<compile_context>
chip_gen: v5e
topology: v5e:2x2
jax: 0.10.0
libtpu: 0.0.40
codegen_flags: <defaults>
</compile_context>

<pallas_src>
import functools
import math

import jax
import jax.numpy as jnp
from jax.experimental import pallas as pl
from jax.experimental.pallas import tpu as pltpu


def _round_up(a, b):
    return ((a + b - 1) // b) * b


def _cdiv(a, b):
    return (a + b - 1) // b


# ---------------------------------------------------------------------------
# Kernels
# ---------------------------------------------------------------------------
def _glu_kernel_single_k(x_ref, wg_ref, wp_ref, bg_ref, bp_ref, o_ref):
    """K fits in one tile: 2-D grid, no accumulator scratch, fully fused."""
    x = x_ref[...]
    g = jnp.dot(x, wg_ref[...], preferred_element_type=jnp.float32) + bg_ref[...]
    p = jnp.dot(x, wp_ref[...], preferred_element_type=jnp.float32) + bp_ref[...]
    o_ref[...] = (jnp.maximum(g, 0.0) * p).astype(o_ref.dtype)


def _glu_kernel_multi_k(x_ref, wg_ref, wp_ref, bg_ref, bp_ref, o_ref,
                        accg_ref, accp_ref):
    """K split across grid axis 2: f32 accumulators resident in VMEM."""
    k = pl.program_id(2)

    @pl.when(k == 0)
    def _():
        # Fold the bias into the accumulator init (saves a zero-fill + add).
        accg_ref[...] = jnp.broadcast_to(bg_ref[...], accg_ref.shape)
        accp_ref[...] = jnp.broadcast_to(bp_ref[...], accp_ref.shape)

    x = x_ref[...]
    accg_ref[...] += jnp.dot(x, wg_ref[...], preferred_element_type=jnp.float32)
    accp_ref[...] += jnp.dot(x, wp_ref[...], preferred_element_type=jnp.float32)

    @pl.when(k == pl.num_programs(2) - 1)
    def _():
        o_ref[...] = (jnp.maximum(accg_ref[...], 0.0)
                      * accp_ref[...]).astype(o_ref.dtype)


# ---------------------------------------------------------------------------
# Wrapper
# ---------------------------------------------------------------------------
@functools.partial(jax.jit, static_argnames=("tm", "tn", "tk", "mxu_dtype"))
def glu_forward(x, wg, bg, wp, bp, *, tm=512, tn=512, tk=2048,
                mxu_dtype=jnp.bfloat16):
    """ReLU(x @ wg + bg) * (x @ wp + bp).

    x : (..., d0); wg/wp : (d0, d1) (== PyTorch Linear weight.T); bg/bp : (d1,).
    mxu_dtype : matmul-operand dtype (default bf16 = native MXU rate on
                v5e/v6e/v7x; accumulation is always f32). None keeps operand
                dtypes as given (e.g. pass f32 weights for exact math).
    All pads/casts are trace-time conditional: feed weights already
    128-aligned and already in mxu_dtype (cast once at load time) and the
    per-call weight-side HBM traffic disappears entirely.
    """
    d0, d1 = wg.shape
    lead = x.shape[:-1]
    m = math.prod(lead) if lead else 1
    if m == 0:  # empty batch: nothing to do
        return jnp.zeros((*lead, d1), x.dtype)

    # ---------------- tile derivation (lane/sublane aligned) ---------------
    m8 = _round_up(m, 8)
    nm = _cdiv(m8, tm)
    tm_eff = _round_up(_cdiv(m8, nm), 8)          # balanced ragged-M tiles
    d1_r = _round_up(d1, 128)
    nj = _cdiv(d1_r, tn)
    tn_eff = _round_up(_cdiv(d1_r, nj), 128)
    # v7x shards the "parallel" grid axes over 2 TensorCores: guarantee >= 2
    # parallel tiles so the second core is not idle.
    if nm * nj == 1:
        if d1_r >= 256:
            nj = 2
            tn_eff = _round_up(_cdiv(d1_r, nj), 128)
        elif m8 >= 16:
            nm = 2
            tm_eff = _round_up(_cdiv(m8, nm), 8)
    m_pad = nm * tm_eff
    d1_pad = nj * tn_eff

    d0_r = _round_up(d0, 128)
    if d0_r <= tk:                                # single-K fast path
        nk, tk_eff = 1, d0_r
    else:
        nk = _cdiv(d0_r, tk)
        tk_eff = _round_up(_cdiv(d0_r, nk), 128)
    d0_pad = nk * tk_eff

    # ---------------- operand prep (all branches are trace-time) -----------
    out_dtype = x.dtype
    x2 = x.reshape(m, d0)
    if (m_pad, d0_pad) != (m, d0):
        x2 = jnp.pad(x2, ((0, m_pad - m), (0, d0_pad - d0)))
    if mxu_dtype is not None and x2.dtype != mxu_dtype:
        x2 = x2.astype(mxu_dtype)

    def _prep_w(w):
        if (d0_pad, d1_pad) != (d0, d1):
            w = jnp.pad(w, ((0, d0_pad - d0), (0, d1_pad - d1)))
        if mxu_dtype is not None and w.dtype != mxu_dtype:
            w = w.astype(mxu_dtype)
        return w

    def _prep_b(b):
        b = b.reshape(1, d1)
        if d1_pad != d1:
            b = jnp.pad(b, ((0, 0), (0, d1_pad - d1)))
        if b.dtype != jnp.float32:
            b = b.astype(jnp.float32)
        return b

    wg_p, wp_p = _prep_w(wg), _prep_w(wp)
    bg_p, bp_p = _prep_b(bg), _prep_b(bp)

    # ---------------- VMEM budget (v7x: 64 MiB / TensorCore) ---------------
    xb = jnp.dtype(x2.dtype).itemsize
    wb = jnp.dtype(wg_p.dtype).itemsize
    ob = jnp.dtype(out_dtype).itemsize
    est = (2 * tm_eff * tk_eff * xb            # x tile (double-buffered)
           + 2 * 2 * tk_eff * tn_eff * wb      # Wg + Wp tiles
           + 2 * tm_eff * tn_eff * ob          # output tile
           + 2 * 2 * tn_eff * 4                # bias rows
           + 2 * tm_eff * tn_eff * 4)          # f32 accumulators / epilogue
    vmem_limit = max(32 << 20, min(int(est * 1.5) + (4 << 20), 64 << 20))

    if nk == 1:
        grid = (nm, nj)
        kernel = _glu_kernel_single_k
        in_specs = [
            pl.BlockSpec((tm_eff, tk_eff), lambda i, j: (i, 0)),   # x
            pl.BlockSpec((tk_eff, tn_eff), lambda i, j: (0, j)),   # Wg
            pl.BlockSpec((tk_eff, tn_eff), lambda i, j: (0, j)),   # Wp
            pl.BlockSpec((1, tn_eff), lambda i, j: (0, j)),        # bg
            pl.BlockSpec((1, tn_eff), lambda i, j: (0, j)),        # bp
        ]
        out_specs = pl.BlockSpec((tm_eff, tn_eff), lambda i, j: (i, j))
        scratch_shapes = []
        dim_sem = ("parallel", "parallel")
    else:
        grid = (nm, nj, nk)
        kernel = _glu_kernel_multi_k
        in_specs = [
            pl.BlockSpec((tm_eff, tk_eff), lambda i, j, k: (i, k)),   # x
            pl.BlockSpec((tk_eff, tn_eff), lambda i, j, k: (k, j)),   # Wg
            pl.BlockSpec((tk_eff, tn_eff), lambda i, j, k: (k, j)),   # Wp
            pl.BlockSpec((1, tn_eff), lambda i, j, k: (0, j)),        # bg
            pl.BlockSpec((1, tn_eff), lambda i, j, k: (0, j)),        # bp
        ]
        out_specs = pl.BlockSpec((tm_eff, tn_eff), lambda i, j, k: (i, j))
        scratch_shapes = [pltpu.VMEM((tm_eff, tn_eff), jnp.float32),
                          pltpu.VMEM((tm_eff, tn_eff), jnp.float32)]
        dim_sem = ("parallel", "parallel", "arbitrary")

    out = pl.pallas_call(
        kernel,
        out_shape=jax.ShapeDtypeStruct((m_pad, d1_pad), out_dtype),
        grid_spec=pltpu.PrefetchScalarGridSpec(
            num_scalar_prefetch=0,
            grid=grid,
            in_specs=in_specs,
            out_specs=out_specs,
            scratch_shapes=scratch_shapes,
        ),
        compiler_params=pltpu.CompilerParams(
            dimension_semantics=dim_sem,
            vmem_limit_bytes=vmem_limit,
        ),
    )(x2, wg_p, wp_p, bg_p, bp_p)

    if (m_pad, d1_pad) != (m, d1):
        out = out[:m, :d1]
    return out.reshape(*lead, d1)


# ---------------------------------------------------------------------------
# Helpers / self-test
# ---------------------------------------------------------------------------
def init_glu_params(key, d0, d1, dtype=jnp.float32):
    """torch.nn.Linear default init (U[-1/sqrt(d0), 1/sqrt(d0)]).
    Weights stored as (d0, d1) == PyTorch weight.T."""
    k1, k2, k3, k4 = jax.random.split(key, 4)
    bound = 1.0 / (d0 ** 0.5)
    wg = jax.random.uniform(k1, (d0, d1), dtype, minval=-bound, maxval=bound)
    bg = jax.random.uniform(k2, (d1,), dtype, minval=-bound, maxval=bound)
    wp = jax.random.uniform(k3, (d0, d1), dtype, minval=-bound, maxval=bound)
    bp = jax.random.uniform(k4, (d1,), dtype, minval=-bound, maxval=bound)
    return wg, bg, wp, bp


def glu_reference(x, wg, bg, wp, bp):
    hi = jax.lax.Precision.HIGHEST
    g = jnp.matmul(x, wg, precision=hi) + bg
    p = jnp.matmul(x, wp, precision=hi) + bp
    return jnp.maximum(g, 0.0) * p


if __name__ == "__main__":
    key = jax.random.PRNGKey(0)
    kx, kp, kx2, kp2, kx3, kp3 = jax.random.split(key, 6)

    # ---- case 1: aligned shapes, exact f32 MXU path ------------------------
    batch, seq, d0, d1 = 2, 8, 128, 128
    x = jax.random.normal(kx, (batch, seq, d0), jnp.float32)
    wg, bg, wp, bp = init_glu_params(kp, d0, d1)
    ref = glu_reference(x, wg, bg, wp, bp)

    y = jax.block_until_ready(glu_forward(x, wg, bg, wp, bp,
                                          mxu_dtype=jnp.float32))
    assert y.shape == (batch, seq, d1)
    assert jnp.allclose(y, ref, atol=1e-4, rtol=1e-4), "f32 path mismatch"

    # ---- case 2: default bf16-on-MXU path (weights pre-cast once, so the
    #              kernel call has zero per-call weight-side work) -----------
    wg_h, wp_h = wg.astype(jnp.bfloat16), wp.astype(jnp.bfloat16)
    y_bf = jax.block_until_ready(glu_forward(x, wg_h, bg, wp_h, bp))
    assert y_bf.shape == (batch, seq, d1)
    assert jnp.allclose(y_bf, ref, atol=5e-2, rtol=5e-2), "bf16 path mismatch"

    # ---- case 3: ragged (unaligned) shapes, exact f32 path ------------------
    b2, s2, d0b, d1b = 1, 10, 96, 72
    xr = jax.random.normal(kx2, (b2, s2, d0b), jnp.float32)
    wgr, bgr, wpr, bpr = init_glu_params(kp2, d0b, d1b)
    yr = jax.block_until_ready(glu_forward(xr, wgr, bgr, wpr, bpr,
                                           mxu_dtype=jnp.float32))
    assert yr.shape == (b2, s2, d1b)
    assert jnp.allclose(yr, glu_reference(xr, wgr, bgr, wpr, bpr),
                        atol=1e-4, rtol=1e-4), "ragged path mismatch"

    # ---- case 4: force the multi-K accumulator path (tk < d0) ---------------
    m3, d0c, d1c = 32, 384, 128
    x3 = jax.random.normal(kx3, (m3, d0c), jnp.float32)
    wg3, bg3, wp3, bp3 = init_glu_params(kp3, d0c, d1c)
    y3 = jax.block_until_ready(glu_forward(x3, wg3, bg3, wp3, bp3,
                                           tk=128, mxu_dtype=jnp.float32))
    assert y3.shape == (m3, d1c)
    assert jnp.allclose(y3, glu_reference(x3, wg3, bg3, wp3, bp3),
                        atol=1e-4, rtol=1e-4), "multi-K path mismatch"

    print("KERNEL_OK")
</pallas_src>

<mosaic_0001>
module attributes {stable_mosaic.version = 11 : i64} {
  func.func @_glu_kernel_single_k(%arg0: i32, %arg1: i32, %arg2: memref<8x128xf32, #tpu.memory_space<vmem>>, %arg3: memref<128x128xf32, #tpu.memory_space<vmem>>, %arg4: memref<128x128xf32, #tpu.memory_space<vmem>>, %arg5: memref<1x128xf32, #tpu.memory_space<vmem>>, %arg6: memref<1x128xf32, #tpu.memory_space<vmem>>, %arg7: memref<8x128xf32, #tpu.memory_space<vmem>>) attributes {dimension_semantics = [#tpu.dimension_semantics<parallel>, #tpu.dimension_semantics<parallel>], iteration_bounds = array<i64: 2, 1>, scalar_prefetch = 0 : i64, scratch_operands = 0 : i64, tpu.core_type = #tpu.core_type<tc>, window_params = [{transform_indices = @transform_0, window_bounds = array<i64: 8, 128>}, {transform_indices = @transform_1, window_bounds = array<i64: 128, 128>}, {transform_indices = @transform_2, window_bounds = array<i64: 128, 128>}, {transform_indices = @transform_3, window_bounds = array<i64: 1, 128>}, {transform_indices = @transform_4, window_bounds = array<i64: 1, 128>}, {transform_indices = @transform_5, window_bounds = array<i64: 8, 128>}]} {
    %c0 = arith.constant 0 : index
    %c0_0 = arith.constant 0 : index
    %0 = vector.load %arg2[%c0, %c0_0] : memref<8x128xf32, #tpu.memory_space<vmem>>, vector<8x128xf32>
    %c0_1 = arith.constant 0 : index
    %c0_2 = arith.constant 0 : index
    %1 = vector.load %arg3[%c0_1, %c0_2] : memref<128x128xf32, #tpu.memory_space<vmem>>, vector<128x128xf32>
    %cst = arith.constant dense<0.000000e+00> : vector<8x128xf32>
    %2 = tpu.matmul %0, %1, %cst {dimension_numbers = #tpu.dot_dimension_numbers<[1], [0], [0], [1], [0, 0, 1, 1], [], []>} : vector<8x128xf32>, vector<128x128xf32>, vector<8x128xf32> -> vector<8x128xf32>
    %c0_3 = arith.constant 0 : index
    %c0_4 = arith.constant 0 : index
    %3 = vector.load %arg5[%c0_3, %c0_4] : memref<1x128xf32, #tpu.memory_space<vmem>>, vector<1x128xf32>
    %4 = vector.broadcast %3 : vector<1x128xf32> to vector<8x128xf32>
    %5 = arith.addf %2, %4 : vector<8x128xf32>
    %c0_5 = arith.constant 0 : index
    %c0_6 = arith.constant 0 : index
    %6 = vector.load %arg4[%c0_5, %c0_6] : memref<128x128xf32, #tpu.memory_space<vmem>>, vector<128x128xf32>
    %cst_7 = arith.constant dense<0.000000e+00> : vector<8x128xf32>
    %7 = tpu.matmul %0, %6, %cst_7 {dimension_numbers = #tpu.dot_dimension_numbers<[1], [0], [0], [1], [0, 0, 1, 1], [], []>} : vector<8x128xf32>, vector<128x128xf32>, vector<8x128xf32> -> vector<8x128xf32>
    %c0_8 = arith.constant 0 : index
    %c0_9 = arith.constant 0 : index
    %8 = vector.load %arg6[%c0_8, %c0_9] : memref<1x128xf32, #tpu.memory_space<vmem>>, vector<1x128xf32>
    %9 = vector.broadcast %8 : vector<1x128xf32> to vector<8x128xf32>
    %10 = arith.addf %7, %9 : vector<8x128xf32>
    %cst_10 = arith.constant 0.000000e+00 : f32
    %11 = vector.broadcast %cst_10 : f32 to vector<8x128xf32>
    %12 = arith.maximumf %5, %11 : vector<8x128xf32>
    %13 = arith.mulf %12, %10 : vector<8x128xf32>
    %c0_11 = arith.constant 0 : index
    %c0_12 = arith.constant 0 : index
    %14 = vector.load %arg7[%c0_11, %c0_12] : memref<8x128xf32, #tpu.memory_space<vmem>>, vector<8x128xf32>
    tpu.vector_store %arg7[%c0_11, %c0_12], %13 {strides = array<i32>} : memref<8x128xf32, #tpu.memory_space<vmem>>, vector<8x128xf32>,
    return
  }
  func.func @transform_0(%arg0: i32, %arg1: i32) -> (i32, i32) {
    %c0_i32 = arith.constant 0 : i32
    %c0_i32_0 = arith.constant 0 : i32
    return %arg0, %c0_i32 : i32, i32
  }
  func.func @transform_1(%arg0: i32, %arg1: i32) -> (i32, i32) {
    %c0_i32 = arith.constant 0 : i32
    %c0_i32_0 = arith.constant 0 : i32
    return %c0_i32, %arg1 : i32, i32
  }
  func.func @transform_2(%arg0: i32, %arg1: i32) -> (i32, i32) {
    %c0_i32 = arith.constant 0 : i32
    %c0_i32_0 = arith.constant 0 : i32
    return %c0_i32, %arg1 : i32, i32
  }
  func.func @transform_3(%arg0: i32, %arg1: i32) -> (i32, i32) {
    %c0_i32 = arith.constant 0 : i32
    %c0_i32_0 = arith.constant 0 : i32
    return %c0_i32, %arg1 : i32, i32
  }
  func.func @transform_4(%arg0: i32, %arg1: i32) -> (i32, i32) {
    %c0_i32 = arith.constant 0 : i32
    %c0_i32_0 = arith.constant 0 : i32
    return %c0_i32, %arg1 : i32, i32
  }
  func.func @transform_5(%arg0: i32, %arg1: i32) -> (i32, i32) {
    %c0_i32 = arith.constant 0 : i32
    return %arg0, %arg1 : i32, i32
  }
}

</mosaic_0001>

<bundles_post_ra>
// kernel: glu_forward.1
= control target key start
LH: loop header
LB: loop body
LE: loop exit
PB: predicated region body
PF: predicated region fallthrough
CT: control target
= control target key end

     0   :  { %10 = vsyncpa [#allocation3], 0  ;;  %s1033_s0 = inlined_call_operand.hbm [shape: f32[16,128], index: 0, kind: input, shape index: {}]   ;;  %s1034_s1 = inlined_call_operand.hbm [shape: f32[128,128], index: 1, kind: input, shape index: {}]   ;;  %s1035_s2 = inlined_call_operand.hbm [shape: f32[128,128], index: 2, kind: input, shape index: {}]   ;;  %s1036_s3 = inlined_call_operand.vmem [shape: f32[1,128], index: 3, kind: input, shape index: {}]   ;;  %s1037_s4 = inlined_call_operand.vmem [shape: f32[1,128], index: 4, kind: input, shape index: {}]   ;;  %s1038_s5 = inlined_call_operand.hbm [shape: f32[16,128], index: 5, kind: output, shape index: {}]  }
   0x1   :  { %12 = vsyncpa [#allocation3 + $0x1], 0 }
   0x2   :  { %13 = vsyncpa [#allocation6], 0 }
   0x3   :  { %14 = vsyncpa [#allocation4], 0 }
   0x4   :  { %16 = vsyncpa [#allocation4 + $0x1], 0  ;;  %s876_s18 = smov 0   ;;  %s878_s19 = smov 0  }
   0x5   :  { %s880_s20 = smov 0   ;;  %s882_s21 = smov 0  }
   0x6   :  { %s884_s22 = smov 0   ;;  %s886_s23 = smov 0  }
   0x7 LB: > { %s558_s24 = sadd.s32 4294967295, %s840_s23   ;;  %p560_p0 = scmp.ge.s32.totalorder %s840_s23, 1  ;;  %s840_s23 = sphi %s886_s23, %s22_s23   ;;  %s836_s22 = sphi %s884_s22, %s1048_s22   ;;  %s832_s21 = sphi %s882_s21, %s1047_s21   ;;  %s828_s20 = sphi %s880_s20, %s1046_s20   ;;  %s824_s19 = sphi %s878_s19, %s1045_s19   ;;  %s820_s18 = sphi %s876_s18, %s1044_s18  }
   0x8   : > { %p910_p1 = scmp.eq.s32.totalorder %s558_s24, 0  ;;  %p197_p2 = scmp.lt.s32.totalorder %s840_s23, 3 }
   0x9   : > { %s210_s28 = sshll.u32 %s1034_s1, 4  ;;  %s842_s30 = smov [#allocation5]   ;;  %s211_s28 = int_to_ptr.hbm [resolvable:$true] %s210_s28 }
   0xa   : > { %p918_p3 = pnand %p560_p0, %p197_p2  ;;  %s212_s6 = sshll.u32 %s842_s30, 4  ;;  %s213_s6 = int_to_ptr.vmem [resolvable:$true] %s212_s6 }
   0xb   : > { %p565_p6 = scmp.ge.s32.totalorder %s840_s23, 2  ;;  %s226_s9 = sshll.u32 %s1035_s2, 4  ;;  %s227_s9 = int_to_ptr.hbm [resolvable:$true] %s226_s9 }
   0xc   : > { %p589_p4 = pneg %p918_p3  ;;  %s843_s10 = smov 128  }
   0xd   : > { %s844_s11 = smov 8   ;;  %s845_s12 = smov [#allocation7]  }
   0xe   : > { %p590_p5 = pnand %p589_p4, %p910_p1  ;;  %s228_s13 = sshll.u32 %s845_s12, 4  ;;  %s229_s13 = int_to_ptr.vmem [resolvable:$true] %s228_s13 }
   0xf   : > { %s34_s14 = sadd.s32 1, %s836_s22  ;;  %s559_s15 = sadd.s32 4294967294, %s840_s23  }
  0x10   : > { %592 = dma.hbm_to_vmem [thread:$0]  (!%p590_p5), %s211_s28, 2048, %s213_s6, [#allocation6], %s843_s10, %s843_s10, %s844_s11  }
  0x11   : > { %595 = dma.hbm_to_vmem [thread:$0]  (!%p590_p5), %s227_s9, 2048, %s229_s13, [#allocation6], %s843_s10, %s843_s10, %s844_s11  }
  0x12   : > { %p36_p7 = scmp.ge.s32.totalorder %s34_s14, 2  ;;  %s41_s16 = sadd.s32 1, %s828_s20 }
  0x13   : > { %p48_p8 = scmp.ne.s32.totalorder %s828_s20, %s824_s19  ;;  %p49_p9 = scmp.eq.s32.totalorder %s840_s23, 0 }
  0x14   : > { %s1050_s14 = smov (%p36_p7, %s34_s14), 0  ;;  %p54_p10 = scmp.ne.s32.totalorder %s824_s19, %s820_s18 }
  0x15   : > { %s38_s17 = ssub.s32 %s836_s22, %s1050_s14  ;;  %p184_p11 = scmp.eq.s32.totalorder %s558_s24, 1 }
  0x16   : > { %p39_p12 = scmp.eq.s32.totalorder %s38_s17, 0  ;;  %p946_p13 = por %p910_p1, %p54_p10 }
  0x17   : > { %p950_p0 = por %p184_p11, %p48_p8  ;;  %p190_p2 = scmp.eq.s32.totalorder %s559_s15, 1 }
  0x18   : > { %s955_s28 = scalar_select %p39_p12, %s828_s20, %s41_s16  }
  0x19   : > { %p50_p4 = por %p49_p9, %p48_p8  ;;  %p957_p5 = por %p190_p2, %p54_p10 }
  0x1a   : > { %s254_s6 = sand.u32 1, %s828_s20   ;;  %s567_s24 = sshll.u32 %s836_s22, 3 }
  0x1b   : > { %p606_p7 = scmp.lt.s32.totalorder %s840_s23, 2  ;;  %s566_s7 = sshll.u32 %s254_s6, 3 }
  0x1c   : > { %s262_s10 = scalar_lea.hbm %s1033_s0, %s567_s24  ;;  %s258_s12 = scalar_lea.vmem [#allocation2], %s566_s7 }
  0x1d   : > { %s264_s11 = sshll.u32 %s262_s10, 4  ;;  %s266_s13 = sshll.u32 %s258_s12, 4  ;;  %s265_s11 = int_to_ptr.hbm [resolvable:$true] %s264_s11  ;;  %s267_s13 = int_to_ptr.vmem [resolvable:$true] %s266_s13 }
  0x1e   : > { %p597_p11 = pnand %p606_p7, %p50_p4  ;;  %s255_s15 = scalar_lea.sflag [#allocation3], %s254_s6 }
  0x1f   : > { %275 = sbr.rel (%p918_p3) target bundleno = 206 (0xce), region = 40  ;;  %s970_s16 = sand.u32 (!%p918_p3), 1, %s824_s19  }
  0x20   : > { %599 = dma.hbm_to_vmem [thread:$0]  (!%p597_p11), %s265_s11, 128, %s267_s13, %s255_s15  }
  0x21   : > { %s569_s17 = sshll.u32 (!%p918_p3), %s970_s16, 3  ;;  %s278_s24 = scalar_lea.sflag (!%p918_p3), [#allocation3], %s970_s16 }
  0x22   : > { %s976_s7 = scalar_lea.vmem (!%p918_p3), [#allocation2], %s569_s17 }
  0x24   : > { %807 = dma.done.wait (%p946_p13), %s278_s24, 128  }
  0x25   : > { %809 = vsyncadd (%p946_p13), %s278_s24, 4294967168 }
  0x26   : > { %811 = dma.done.wait (%p910_p1), [#allocation6], 4096  }
  0x27   : > { %813 = vsyncadd (%p910_p1), [#allocation6], 4294963200  ;;  %v347_v0 = vld [vmem:[#allocation5 + $0x78] sm:$0xff]  ;;  %v346_v1 = vld [vmem:[#allocation5 + $0x70] sm:$0xff]  ;;  %s574_s25 = sshll.u32 %s832_s21, 3  ;;  %s324_s21 = scalar_lea.vmem [#allocation8], %s569_s17 }
  0x28   : > { %v387_v2 = vld [vmem:[#allocation7 + $0x78] sm:$0xff]  ;;  %352 = vmatpush.msra.mxu0 %v347_v0  ;;  %v386_v3 = vld [vmem:[#allocation7 + $0x70] sm:$0xff]  ;;  %v345_v4 = vld [vmem:[#allocation5 + $0x68] sm:$0xff]  ;;  %s427_s11 = scalar_lea.hbm %s1038_s5, %s574_s25  ;;  %s429_s12 = sshll.u32 %s324_s21, 4  ;;  %s430_s12 = int_to_ptr.vmem [resolvable:$true] %s429_s12 }
  0x29   : > { %392 = vmatpush.msra.mxu1 %v387_v2  ;;  %v385_v5 = vld [vmem:[#allocation7 + $0x68] sm:$0xff]  ;;  %v344_v6 = vld [vmem:[#allocation5 + $0x60] sm:$0xff]  ;;  %v343_v8 = vld [vmem:[#allocation5 + $0x58] sm:$0xff]  ;;  %s431_s13 = sshll.u32 %s427_s11, 4  ;;  %s416_s15 = scalar_lea.sflag [#allocation4], %s970_s16  ;;  %s432_s13 = int_to_ptr.hbm [resolvable:$true] %s431_s13 }
  0x2a   : > { %353 = vmatpush.msra.mxu0 %v346_v1  ;;  %v384_v7 = vld [vmem:[#allocation7 + $0x60] sm:$0xff]  ;;  %v383_v9 = vld [vmem:[#allocation7 + $0x58] sm:$0xff]  ;;  %v342_v10 = vld [vmem:[#allocation5 + $0x50] sm:$0xff]  ;;  %s768_s24 = sshra.s32 %s432_s13, 4  ;;  %s774_s26 = scalar_lea.hbm %s1038_s5, 16  ;;  %s769_s24 = int_to_ptr.hbm [resolvable:$true] %s768_s24 }
  0x2b   : > { %393 = vmatpush.msra.mxu1 %v386_v3  ;;  %v382_v11 = vld [vmem:[#allocation7 + $0x50] sm:$0xff]  ;;  %v341_v12 = vld [vmem:[#allocation5 + $0x48] sm:$0xff]  ;;  %v340_v14 = vld [vmem:[#allocation5 + $0x40] sm:$0xff]  ;;  %p775_p9 = scmp.lt.s32.totalorder %s769_s24, %s1038_s5 }
  0x2c   : > { %354 = vmatpush.msra.mxu0 %v345_v4  ;;  %v381_v13 = vld [vmem:[#allocation7 + $0x48] sm:$0xff]  ;;  %v380_v15 = vld [vmem:[#allocation7 + $0x40] sm:$0xff]  ;;  %v339_v16 = vld [vmem:[#allocation5 + $0x38] sm:$0xff] }
  0x2d   : > { %394 = vmatpush.msra.mxu1 %v385_v5  ;;  %v379_v17 = vld [vmem:[#allocation7 + $0x38] sm:$0xff]  ;;  %v338_v18 = vld [vmem:[#allocation5 + $0x30] sm:$0xff]  ;;  %v337_v20 = vld [vmem:[#allocation5 + $0x28] sm:$0xff] }
  0x2e   : > { %355 = vmatpush.msra.mxu0 %v344_v6  ;;  %v378_v19 = vld [vmem:[#allocation7 + $0x30] sm:$0xff]  ;;  %v377_v21 = vld [vmem:[#allocation7 + $0x28] sm:$0xff]  ;;  %v336_v22 = vld [vmem:[#allocation5 + $0x20] sm:$0xff] }
  0x2f   : > { %395 = vmatpush.msra.mxu1 %v384_v7  ;;  %v376_v23 = vld [vmem:[#allocation7 + $0x20] sm:$0xff]  ;;  %v335_v24 = vld [vmem:[#allocation5 + $0x18] sm:$0xff]  ;;  %v334_v26 = vld [vmem:[#allocation5 + $0x10] sm:$0xff] }
  0x30   : > { %356 = vmatpush.msra.mxu0 %v343_v8  ;;  %v375_v25 = vld [vmem:[#allocation7 + $0x18] sm:$0xff]  ;;  %v374_v27 = vld [vmem:[#allocation7 + $0x10] sm:$0xff]  ;;  %v333_v28 = vld [vmem:[#allocation5 + $0x8] sm:$0xff] }
  0x31   : > { %396 = vmatpush.msra.mxu1 %v383_v9  ;;  %v373_v29 = vld [vmem:[#allocation7 + $0x8] sm:$0xff]  ;;  %v332_v30 = vld [vmem:[#allocation5] sm:$0xff]  ;;  %v331_v32 = vld [vmem:[%s976_s7] sm:$0xff]  ;;  %s770_s7 = scalar_lea.hbm %s769_s24, 8 }
  0x32   : > { %357 = vmatpush.msra.mxu0 %v342_v10  ;;  %v372_v31 = vld [vmem:[#allocation7] sm:$0xff]  ;;  %v662_v33 = vld [vmem:[%s1036_s3] ss:$0 sm:$0xff]  ;;  %p771_p1 = scmp.ne.s32.totalorder %s769_s24, %s770_s7  ;;  %p776_p10 = scmp.lt.s32.totalorder %s774_s26, %s770_s7 }
  0x33   : > { %397 = vmatpush.msra.mxu1 %v382_v11  ;;  %v663_v34 = vld [vmem:[%s1037_s4] ss:$0 sm:$0xff] }
  0x34   : > { %358 = vmatpush.msra.mxu0 %v341_v12  ;;  %p772_p3 = pnand %p771_p1, %p950_p0  ;;  %p777_p12 = por %p776_p10, %p775_p9 }
  0x35   : > { %398 = vmatpush.msra.mxu1 %v381_v13 }
  0x36   : > { %359 = vmatpush.msra.mxu0 %v340_v14  ;;  %p773_p8 = pneg %p772_p3 }
  0x37   : > { %399 = vmatpush.msra.mxu1 %v380_v15 }
  0x38   : > { %360 = vmatpush.msra.mxu0 %v339_v16  ;;  %p778_p13 = pnand %p777_p12, %p773_p8 }
  0x39   : > { %400 = vmatpush.msra.mxu1 %v379_v17 }
  0x3a   : > { %361 = vmatpush.msra.mxu0 %v338_v18 }
  0x3b   : > { %401 = vmatpush.msra.mxu1 %v378_v19 }
  0x3c   : > { %362 = vmatpush.msra.mxu0 %v337_v20 }
  0x3d   : > { %402 = vmatpush.msra.mxu1 %v377_v21 }
  0x3e   : > { %363 = vmatpush.msra.mxu0 %v336_v22 }
  0x3f   : > { %403 = vmatpush.msra.mxu1 %v376_v23 }
  0x40   : > { %364 = vmatpush.msra.mxu0 %v335_v24 }
  0x41   : > { %404 = vmatpush.msra.mxu1 %v375_v25 }
  0x42   : > { %365 = vmatpush.msra.mxu0 %v334_v26 }
  0x43   : > { %405 = vmatpush.msra.mxu1 %v374_v27 }
  0x44   : > { %366 = vmatpush.msra.mxu0 %v333_v28 }
  0x45   : > { %406 = vmatpush.msra.mxu1 %v373_v29 }
  0x46   : > { %367 = vmatpush.msra.mxu0 %v332_v30 }
  0x47   : > { %407 = vmatpush.msra.mxu1 %v372_v31  ;;  %368 = vmatmul.f32.vlgmr.msra.gmra.mxu0 %v331_v32 }
  0x48   : > { %408 = vmatmul.f32.vlgmr.msra.gmra.mxu1 %v331_v32 }
  0xc4   : > { %v369_v35 = vpop.f32.mrf.mxu0 }
  0xc5   : > { %v409_v36 = vpop.f32.mrf.mxu1  ;;  %v370_v37 = vadd.f32 %v662_v33, %v369_v35 }
  0xc6   : > { %v410_v38 = vadd.f32 %v663_v34, %v409_v36 }
  0xc7   : > { %v412_v39 = vmax.f32 %v370_v37, 0.0 }
  0xc9   : > { %v413_v40 = vmul.f32 %v412_v39, %v410_v38 }
  0xcb   : > { %414 = vst [vmem:[%s324_s21] sm:$0xff] %v413_v40 }
  0xcc   : > { %781 = shalt.err (!%p778_p13)
}
  0xcd   : > { %587 = dma.vmem_to_hbm [thread:$0]  (%p950_p0), %s430_s12, 128, %s432_s13, %s416_s15  }
  0xce PF: > { %s443_s16 = sand.u32 1, %s820_s18   ;;  %p601_p2 = pnand %p565_p6, %p957_p5 }
  0xcf   : > { %s444_s8 = scalar_lea.sflag [#allocation4], %s443_s16 }
  0xd0   : > { %p602_p4 = pneg %p601_p2 }
  0xd2   : > { %815 = dma.done.wait (%p602_p4), %s444_s8, 128  }
  0xd3   : > { %817 = vsyncadd (%p602_p4), %s444_s8, 4294967168  ;;  %s22_s23 = sadd.s32 1, %s840_s23   ;;  %s1044_s18 = smov %s824_s19 }
  0xd4   : > { %p19_p7 = scmp.ge.s32.totalorder %s22_s23, 4   ;;  %s1045_s19 = smov %s828_s20 }
  0xd5   : > { %s1046_s20 = smov %s955_s28  ;;  %s1047_s21 = smov %s836_s22 }
  0xd6   : > { %s1048_s22 = smov %s1050_s14  ;;  %21 = sbr.rel (!%p19_p7) target bundleno = 7 (0x7), region = 101 }
  0xdb   :  { %450 = vsyncpa [#allocation3], 1 }
  0xdc   :  { %452 = vsyncpa [#allocation3 + $0x1], 1 }
  0xdd   :  { %453 = vsyncpa [#allocation6], 1 }
  0xde   :  { %454 = vsyncpa [#allocation4], 1 }
  0xdf   :  { %456 = vsyncpa [#allocation4 + $0x1], 1 }

</bundles_post_ra>
